<compile_context>
chip_gen: v7x
topology: tpu7x:2x2x1
jax: 0.10.0
libtpu: 0.0.40
codegen_flags: <defaults>
</compile_context>

<pallas_src>
import jax
import jax.numpy as jnp
from jax.experimental import pallas as pl
from jax.experimental.pallas import tpu as pltpu

_LANES = 128
_SUBLANES = 8
_MAX_BLOCK_ROWS = 512            # (512,128) f32 = 256 KiB per buffer
_PALLAS_MIN_ELEMENTS = 1 << 15   # below this, plain jnp (overhead-bound regime)


def _ceil_div(a: int, b: int) -> int:
    return -(-a // b)


# ----------------------------- Pallas kernels ------------------------------

def _affine_kernel(x_ref, scale_ref, bias_ref, out_ref):
    # One elementwise FMA per block; compute in f32, store in I/O dtype.
    x = x_ref[...].astype(jnp.float32)
    out_ref[...] = (x * scale_ref[...] + bias_ref[...]).astype(out_ref.dtype)


def _roundtrip_kernel(pos_ref, sm_ref, bm_ref, sa_ref, ba_ref, ang_ref, mot_ref):
    # Fused motor->angle->motor. Two output streams; prefer the single-output
    # _affine_kernel when only one direction is needed (v5e has 1 vst slot).
    pos = pos_ref[...].astype(jnp.float32)
    ang = pos * sm_ref[...] + bm_ref[...]
    ang_ref[...] = ang.astype(ang_ref.dtype)
    mot_ref[...] = (ang * sa_ref[...] + ba_ref[...]).astype(mot_ref.dtype)


# ---------------------------- Pallas call wrappers --------------------------

def _tile_geometry(n: int):
    """Return (padded_rows, block_rows) for a lane-dense [Rp, 128] slab."""
    rows = _ceil_div(max(n, 1), _LANES)
    rows8 = _ceil_div(rows, _SUBLANES) * _SUBLANES          # sublane multiple
    tr = min(_MAX_BLOCK_ROWS, rows8)                        # multiple of 8
    rp = _ceil_div(rows8, tr) * tr                          # multiple of tr
    return rp, tr


def _to_slab(flat: jnp.ndarray, rp: int) -> jnp.ndarray:
    """Pad a flat [N] array with zeros and reshape to lane-dense [rp, 128]."""
    n = flat.shape[0]
    pad = rp * _LANES - n
    if pad:
        flat = jnp.pad(flat, (0, pad))
    return flat.reshape(rp, _LANES)


def _block_spec(tr: int) -> pl.BlockSpec:
    return pl.BlockSpec((tr, _LANES), lambda i: (i, 0))


def _affine_call(x_slab, scale_slab, bias_slab, tr):
    rp = x_slab.shape[0]
    spec = _block_spec(tr)
    return pl.pallas_call(
        _affine_kernel,
        out_shape=jax.ShapeDtypeStruct(x_slab.shape, x_slab.dtype),
        grid=(rp // tr,),
        in_specs=[spec, spec, spec],
        out_specs=spec,
        compiler_params=pltpu.CompilerParams(
            dimension_semantics=("parallel",)),
    )(x_slab, scale_slab, bias_slab)


def _roundtrip_call(x_slab, sm_slab, bm_slab, sa_slab, ba_slab, tr):
    rp = x_slab.shape[0]
    spec = _block_spec(tr)
    return pl.pallas_call(
        _roundtrip_kernel,
        out_shape=(jax.ShapeDtypeStruct(x_slab.shape, x_slab.dtype),
                   jax.ShapeDtypeStruct(x_slab.shape, x_slab.dtype)),
        grid=(rp // tr,),
        in_specs=[spec, spec, spec, spec, spec],
        out_specs=(spec, spec),
        compiler_params=pltpu.CompilerParams(
            dimension_semantics=("parallel",)),
    )(x_slab, sm_slab, bm_slab, sa_slab, ba_slab)


# ------------------------------ Module wrapper ------------------------------

class Actuators:
    """JAX/Pallas port of the abstract Actuators template (linear actuator semantics)."""

    def __init__(self, actuator_parameters: jnp.ndarray) -> None:
        # actuator_parameters: [num_heliostats, num_actuators, 4] with last axis
        # = [clockwise_flag, increment, offset, initial_angle].
        self.actuator_parameters = actuator_parameters
        # torch.empty_like -> uninitialized; JAX has none, use zeros_like.
        self.active_actuator_parameters = jnp.zeros_like(actuator_parameters)

        p = actuator_parameters.astype(jnp.float32)
        cw, inc, off, init = p[..., 0], p[..., 1], p[..., 2], p[..., 3]
        sign = jnp.where(cw > 0.5, -1.0, 1.0)
        # Guard: a zero / denormal increment would otherwise produce inf/nan
        # coefficients silently.
        inc_safe = jnp.where(jnp.abs(inc) < 1e-12, 1e-12, inc)

        self._data_shape = cw.shape          # [H, A]
        self._n = int(cw.size)               # H * A

        # Fused affine coefficients, computed once (static parameters).
        scale_m2a = sign * inc               # angle = pos * scale + bias
        bias_m2a = init - scale_m2a * off
        scale_a2m = sign / inc_safe          # motor = ang * scale + bias
        bias_a2m = off - scale_a2m * init

        # Coefficients in original [H, A] layout for the fused-jnp small path.
        self._scale_m2a = scale_m2a
        self._bias_m2a = bias_m2a
        self._scale_a2m = scale_a2m
        self._bias_a2m = bias_a2m

        # Lane-dense padded [Rp, 128] coefficient slabs for the Pallas path
        # (padded with zeros -> padded outputs are 0 and discarded).
        rp, tr = _tile_geometry(self._n)
        self._rp, self._tr = rp, tr
        self._scale_m2a_slab = _to_slab(scale_m2a.reshape(-1), rp)
        self._bias_m2a_slab = _to_slab(bias_m2a.reshape(-1), rp)
        self._scale_a2m_slab = _to_slab(scale_a2m.reshape(-1), rp)
        self._bias_a2m_slab = _to_slab(bias_a2m.reshape(-1), rp)

    # ------------------------------------------------------------------ util
    def _take_pallas_path(self, use_pallas) -> bool:
        if use_pallas is None:
            return self._n >= _PALLAS_MIN_ELEMENTS
        return bool(use_pallas)

    def _from_slab(self, slab: jnp.ndarray, like: jnp.ndarray) -> jnp.ndarray:
        return slab.reshape(-1)[: self._n].reshape(like.shape)

    # ----------------------------------------------------------- conversions
    def motor_positions_to_angles(self, motor_positions: jnp.ndarray,
                                  use_pallas=None) -> jnp.ndarray:
        if not self._take_pallas_path(use_pallas):
            # Overhead-bound regime: plain jnp FMA, XLA fuses with neighbors.
            out = (motor_positions.astype(jnp.float32) * self._scale_m2a
                   + self._bias_m2a)
            return out.astype(motor_positions.dtype)
        x_slab = _to_slab(motor_positions.reshape(-1), self._rp)
        out = _affine_call(x_slab, self._scale_m2a_slab, self._bias_m2a_slab,
                           self._tr)
        return self._from_slab(out, motor_positions)

    def angles_to_motor_positions(self, angles: jnp.ndarray,
                                  use_pallas=None) -> jnp.ndarray:
        if not self._take_pallas_path(use_pallas):
            out = (angles.astype(jnp.float32) * self._scale_a2m
                   + self._bias_a2m)
            return out.astype(angles.dtype)
        x_slab = _to_slab(angles.reshape(-1), self._rp)
        out = _affine_call(x_slab, self._scale_a2m_slab, self._bias_a2m_slab,
                           self._tr)
        return self._from_slab(out, angles)

    def motor_positions_roundtrip(self, motor_positions: jnp.ndarray,
                                  use_pallas=None):
        """Fused motor->angle->motor (one launch, two outputs, on the Pallas path)."""
        if not self._take_pallas_path(use_pallas):
            ang = self.motor_positions_to_angles(motor_positions, use_pallas=False)
            mot = self.angles_to_motor_positions(ang, use_pallas=False)
            return ang, mot
        x_slab = _to_slab(motor_positions.reshape(-1), self._rp)
        ang_slab, mot_slab = _roundtrip_call(
            x_slab, self._scale_m2a_slab, self._bias_m2a_slab,
            self._scale_a2m_slab, self._bias_a2m_slab, self._tr)
        return (self._from_slab(ang_slab, motor_positions),
                self._from_slab(mot_slab, motor_positions))

    def forward(self) -> None:
        # TODO(synk): abstract base — forward() has no computation to port; it
        # raises exactly like the reference module.
        raise NotImplementedError("Must be overridden!")


# ----------------------------------- main -----------------------------------

if __name__ == "__main__":
    key = jax.random.PRNGKey(0)
    k_small_p, k_small_x, k_med_p, k_med_x = jax.random.split(key, 4)

    def make_params(k, H, A):
        clockwise = (jax.random.uniform(k, (H, A)) > 0.5).astype(jnp.float32)
        increments = jnp.full((H, A), 0.001, dtype=jnp.float32)
        offsets = jnp.linspace(100.0, 200.0, H * A,
                               dtype=jnp.float32).reshape(H, A)
        initial_angles = jnp.linspace(-0.5, 0.5, H * A,
                                      dtype=jnp.float32).reshape(H, A)
        params = jnp.stack([clockwise, increments, offsets, initial_angles],
                           axis=-1)
        return params, (clockwise, increments, offsets, initial_angles)

    def reference(pos, raw):
        clockwise, increments, offsets, initial_angles = raw
        sign = jnp.where(clockwise > 0.5, -1.0, 1.0)
        return initial_angles + sign * (pos - offsets) * increments

    # --- Small case (8x2): default path = fused plain-jnp (overhead-bound). --
    params_s, raw_s = make_params(k_small_p, 8, 2)
    act_s = Actuators(params_s)
    pos_s = 1000.0 * jax.random.uniform(k_small_x, (8, 2), dtype=jnp.float32)

    ang_s = act_s.motor_positions_to_angles(pos_s)                 # jnp path
    mot_s = act_s.angles_to_motor_positions(ang_s)                 # jnp path
    ang_s_pl = act_s.motor_positions_to_angles(pos_s, use_pallas=True)   # force kernel
    mot_s_pl = act_s.angles_to_motor_positions(ang_s_pl, use_pallas=True)
    jax.block_until_ready((ang_s, mot_s, ang_s_pl, mot_s_pl))

    ang_s_ref = reference(pos_s, raw_s)
    assert jnp.allclose(ang_s, ang_s_ref, rtol=1e-5, atol=1e-5)
    assert jnp.allclose(ang_s_pl, ang_s_ref, rtol=1e-5, atol=1e-5)
    assert jnp.allclose(mot_s, pos_s, rtol=1e-4, atol=1e-2)
    assert jnp.allclose(mot_s_pl, pos_s, rtol=1e-4, atol=1e-2)

    # --- Medium case (4096x2): exercise the lane-dense gridded Pallas path. --
    params_m, raw_m = make_params(k_med_p, 4096, 2)
    act_m = Actuators(params_m)
    pos_m = 1000.0 * jax.random.uniform(k_med_x, (4096, 2), dtype=jnp.float32)

    ang_m = act_m.motor_positions_to_angles(pos_m, use_pallas=True)
    mot_m = act_m.angles_to_motor_positions(ang_m, use_pallas=True)
    ang_f, mot_f = act_m.motor_positions_roundtrip(pos_m, use_pallas=True)
    jax.block_until_ready((ang_m, mot_m, ang_f, mot_f))

    ang_m_ref = reference(pos_m, raw_m)
    assert jnp.allclose(ang_m, ang_m_ref, rtol=1e-5, atol=1e-5)
    assert jnp.allclose(ang_f, ang_m_ref, rtol=1e-5, atol=1e-5)
    assert jnp.allclose(mot_m, pos_m, rtol=1e-4, atol=1e-2)
    assert jnp.allclose(mot_f, pos_m, rtol=1e-4, atol=1e-2)

    # bf16 I/O sanity check on the Pallas path (compute stays f32 in-kernel).
    ang_bf16 = act_m.motor_positions_to_angles(pos_m.astype(jnp.bfloat16),
                                               use_pallas=True)
    jax.block_until_ready(ang_bf16)
    assert ang_bf16.dtype == jnp.bfloat16
    assert jnp.allclose(ang_bf16.astype(jnp.float32), ang_m_ref,
                        rtol=2e-2, atol=2e-2)

    print("KERNEL_OK")
</pallas_src>

<mosaic_0001>
module attributes {stable_mosaic.version = 11 : i64} {
  func.func @_affine_kernel(%arg0: i32, %arg1: memref<8x128xf32, #tpu.memory_space<vmem>>, %arg2: memref<8x128xf32, #tpu.memory_space<vmem>>, %arg3: memref<8x128xf32, #tpu.memory_space<vmem>>, %arg4: memref<8x128xf32, #tpu.memory_space<vmem>>) attributes {dimension_semantics = [#tpu.dimension_semantics<parallel>], iteration_bounds = array<i64: 1>, scalar_prefetch = 0 : i64, scratch_operands = 0 : i64, tpu.core_type = #tpu.core_type<tc>, window_params = [{transform_indices = @transform_0, window_bounds = array<i64: 8, 128>}, {transform_indices = @transform_1, window_bounds = array<i64: 8, 128>}, {transform_indices = @transform_2, window_bounds = array<i64: 8, 128>}, {transform_indices = @transform_3, window_bounds = array<i64: 8, 128>}]} {
    %c0 = arith.constant 0 : index
    %c0_0 = arith.constant 0 : index
    %0 = vector.load %arg1[%c0, %c0_0] : memref<8x128xf32, #tpu.memory_space<vmem>>, vector<8x128xf32>
    %c0_1 = arith.constant 0 : index
    %c0_2 = arith.constant 0 : index
    %1 = vector.load %arg2[%c0_1, %c0_2] : memref<8x128xf32, #tpu.memory_space<vmem>>, vector<8x128xf32>
    %2 = arith.mulf %0, %1 : vector<8x128xf32>
    %c0_3 = arith.constant 0 : index
    %c0_4 = arith.constant 0 : index
    %3 = vector.load %arg3[%c0_3, %c0_4] : memref<8x128xf32, #tpu.memory_space<vmem>>, vector<8x128xf32>
    %4 = arith.addf %2, %3 : vector<8x128xf32>
    %c0_5 = arith.constant 0 : index
    %c0_6 = arith.constant 0 : index
    %5 = vector.load %arg4[%c0_5, %c0_6] : memref<8x128xf32, #tpu.memory_space<vmem>>, vector<8x128xf32>
    tpu.vector_store %arg4[%c0_5, %c0_6], %4 {strides = array<i32>} : memref<8x128xf32, #tpu.memory_space<vmem>>, vector<8x128xf32>,
    return
  }
  func.func @transform_0(%arg0: i32) -> (i32, i32) {
    %c0_i32 = arith.constant 0 : i32
    %c0_i32_0 = arith.constant 0 : i32
    return %arg0, %c0_i32 : i32, i32
  }
  func.func @transform_1(%arg0: i32) -> (i32, i32) {
    %c0_i32 = arith.constant 0 : i32
    %c0_i32_0 = arith.constant 0 : i32
    return %arg0, %c0_i32 : i32, i32
  }
  func.func @transform_2(%arg0: i32) -> (i32, i32) {
    %c0_i32 = arith.constant 0 : i32
    %c0_i32_0 = arith.constant 0 : i32
    return %arg0, %c0_i32 : i32, i32
  }
  func.func @transform_3(%arg0: i32) -> (i32, i32) {
    %c0_i32 = arith.constant 0 : i32
    %c0_i32_0 = arith.constant 0 : i32
    return %arg0, %c0_i32 : i32, i32
  }
}

</mosaic_0001>

<bundles_post_ra>
// kernel: tpu_custom_call.1
= control target key start
LH: loop header
LB: loop body
LE: loop exit
PB: predicated region body
PF: predicated region fallthrough
CT: control target
= control target key end

     0   :  { %8 = vsyncpa [#allocation3], 0  ;;  %s242_s0 = inlined_call_operand.hbm [shape: f32[8,128], index: 0, kind: input, shape index: {}]   ;;  %s243_s1 = inlined_call_operand.hbm [shape: f32[8,128], index: 1, kind: input, shape index: {}]   ;;  %s244_s2 = inlined_call_operand.hbm [shape: f32[8,128], index: 2, kind: input, shape index: {}]   ;;  %s245_s3 = inlined_call_operand.hbm [shape: f32[8,128], index: 3, kind: output, shape index: {}]  }
   0x1   :  { %9 = vsyncpa [#allocation6], 0 }
   0x2   :  { %10 = vsyncpa [#allocation4], 0  ;;  %s170_s12 = smov [#allocation5]   ;;  %s171_s14 = smov [#allocation2]  }
   0x3   :  { %s27_s13 = sshll.u32 %s170_s12, 4  ;;  %s17_s15 = sshll.u32 %s171_s14, 4  ;;  %s28_s13 = int_to_ptr.vmem [resolvable:$true] %s27_s13  ;;  %s18_s15 = int_to_ptr.vmem [resolvable:$true] %s17_s15 }
   0x4   :  { %s76_s18 = scalar_lea.hbm %s243_s1, 128 }
   0x5   :  { %p77_p0 = scmp.ne.s32.totalorder %s243_s1, %s76_s18  ;;  %p80_p1 = scmp.lt.u32.totalorder %s76_s18, %s243_s1 }
   0x7   :  { %p82_p2 = pnand %p80_p1, %p77_p0 }
   0x9   :  { %85 = shalt.err (!%p82_p2)
}
   0xa   :  { %s86_s23 = scalar_lea.vmem %s28_s13, 128  ;;  %p91_p4 = scmp.lt.s32.totalorder %s28_s13, %s28_s13 }
   0xb   :  { %p87_p3 = scmp.ne.s32.totalorder %s28_s13, %s86_s23  ;;  %p92_p5 = scmp.lt.s32.totalorder %s86_s23, %s86_s23 }
   0xd   :  { %p93_p6 = por %p92_p5, %p91_p4 }
   0xf   :  { %p94_p7 = pnand %p93_p6, %p87_p3 }
  0x11   :  { %97 = shalt.err (!%p94_p7)
}
  0x12   :  { %30 = dma.hbm_to_vmem [thread:$0]  %s243_s1, 128, %s28_s13, [#allocation6]  }
  0x13   :  { %s98_s28 = scalar_lea.hbm %s242_s0, 128 }
  0x14   :  { %p99_p8 = scmp.ne.s32.totalorder %s242_s0, %s98_s28  ;;  %p102_p9 = scmp.lt.u32.totalorder %s98_s28, %s242_s0 }
  0x16   :  { %p104_p10 = pnand %p102_p9, %p99_p8 }
  0x18   :  { %107 = shalt.err (!%p104_p10)
}
  0x19   :  { %s108_s6 = scalar_lea.vmem %s18_s15, 128  ;;  %p113_p12 = scmp.lt.s32.totalorder %s18_s15, %s18_s15 }
  0x1a   :  { %p109_p11 = scmp.ne.s32.totalorder %s18_s15, %s108_s6  ;;  %p114_p13 = scmp.lt.s32.totalorder %s108_s6, %s108_s6 }
  0x1c   :  { %p115_p0 = por %p114_p13, %p113_p12 }
  0x1e   :  { %p116_p1 = pnand %p115_p0, %p109_p11 }
  0x20   :  { %119 = shalt.err (!%p116_p1)
}
  0x21   :  { %20 = dma.hbm_to_vmem [thread:$0]  %s242_s0, 128, %s18_s15, [#allocation3]  }
  0x22   :  { %s172_s8 = smov [#allocation7]   ;;  %s120_s12 = scalar_lea.hbm %s244_s2, 128 }
  0x23   :  { %s37_s9 = sshll.u32 %s172_s8, 4  ;;  %p121_p2 = scmp.ne.s32.totalorder %s244_s2, %s120_s12  ;;  %s38_s9 = int_to_ptr.vmem [resolvable:$true] %s37_s9 }
  0x24   :  { %p124_p3 = scmp.lt.u32.totalorder %s120_s12, %s244_s2 }
  0x26   :  { %p126_p4 = pnand %p124_p3, %p121_p2 }
  0x28   :  { %129 = shalt.err (!%p126_p4)
}
  0x29   :  { %s130_s18 = scalar_lea.vmem %s38_s9, 128  ;;  %p135_p6 = scmp.lt.s32.totalorder %s38_s9, %s38_s9 }
  0x2a   :  { %p131_p5 = scmp.ne.s32.totalorder %s38_s9, %s130_s18  ;;  %p136_p7 = scmp.lt.s32.totalorder %s130_s18, %s130_s18 }
  0x2c   :  { %p137_p8 = por %p136_p7, %p135_p6 }
  0x2e   :  { %p138_p9 = pnand %p137_p8, %p131_p5 }
  0x30   :  { %141 = shalt.err (!%p138_p9)
}
  0x31   :  { %40 = dma.hbm_to_vmem [thread:$0]  %s244_s2, 128, %s38_s9, [#allocation6]  }
  0x32   :  { %164 = dma.done.wait [#allocation3], 128  }
  0x33   :  { %165 = vsyncadd [#allocation3], 4294967168 }
  0x34   :  { %166 = dma.done.wait [#allocation6], 256  }
  0x35   :  { %167 = vsyncadd [#allocation6], 4294967040  ;;  %v50_v0 = vld [vmem:[#allocation2] sm:$0xff]  ;;  %v51_v1 = vld [vmem:[#allocation5] sm:$0xff]  ;;  %s173_s19 = smov [#allocation8]  }
  0x36   :  { %v53_v2 = vld [vmem:[#allocation7] sm:$0xff]  ;;  %s62_s20 = sshll.u32 %s173_s19, 4  ;;  %v52_v3 = vmul.f32 %v51_v1, %v50_v0  ;;  %s63_s20 = int_to_ptr.vmem [resolvable:$true] %s62_s20 }
  0x37   :  { %s142_s21 = scalar_lea.vmem %s63_s20, 128  ;;  %p147_p11 = scmp.lt.s32.totalorder %s63_s20, %s63_s20 }
  0x38   :  { %v54_v4 = vadd.f32 %v53_v2, %v52_v3  ;;  %p143_p10 = scmp.ne.s32.totalorder %s63_s20, %s142_s21  ;;  %p148_p12 = scmp.lt.s32.totalorder %s142_s21, %s142_s21 }
  0x3a   :  { %55 = vst [vmem:[#allocation8] sm:$0xff] %v54_v4  ;;  %p149_p13 = por %p148_p12, %p147_p11 }
  0x3c   :  { %p150_p0 = pnand %p149_p13, %p143_p10 }
  0x3e   :  { %153 = shalt.err (!%p150_p0)
}
  0x3f   :  { %s154_s23 = scalar_lea.hbm %s245_s3, 128 }
  0x40   :  { %p155_p1 = scmp.ne.s32.totalorder %s245_s3, %s154_s23  ;;  %p158_p2 = scmp.lt.u32.totalorder %s154_s23, %s245_s3 }
  0x42   :  { %p160_p3 = pnand %p158_p2, %p155_p1 }
  0x44   :  { %163 = shalt.err (!%p160_p3)
}
  0x45   :  { %65 = dma.vmem_to_hbm [thread:$0]  %s63_s20, 128, %s245_s3, [#allocation4]  }
  0x46   :  { %168 = dma.done.wait [#allocation4], 128  }
  0x47   :  { %169 = vsyncadd [#allocation4], 4294967168 }
  0x48   :  { %69 = vsyncpa [#allocation3], 1 }
  0x49   :  { %70 = vsyncpa [#allocation6], 1 }
  0x4a   :  { %71 = vsyncpa [#allocation4], 1 }

</bundles_post_ra>
